<compile_context>
chip_gen: v6e
topology: v6e:2x2x1
jax: 0.10.0
libtpu: 0.0.40
codegen_flags: <defaults>
</compile_context>

<pallas_src>
import jax
import jax.numpy as jnp
from jax.experimental import pallas as pl
from jax.experimental.pallas import tpu as pltpu


def _round_up(x: int, m: int) -> int:
    return (x + m - 1) // m * m


def _solver_fwd_kernel(x_ref, w_ref, b_ref, scores_ref, acc_ref):
    # x_ref:      [tm, tk]    bfloat16 (VMEM)
    # w_ref:      [tk, N_PAD] bfloat16 (VMEM)
    # b_ref:      [1,  N_PAD] float32  (VMEM)
    # scores_ref: [tm, N_PAD] float32  (VMEM)   -- same block across the K axis
    # acc_ref:    [tm, N_PAD] float32  (VMEM scratch accumulator)
    k = pl.program_id(1)

    @pl.when(k == 0)
    def _init():
        acc_ref[...] = jnp.zeros_like(acc_ref)

    # Hot path: bf16 MXU matmul, f32 accumulation. Inner loop is MXU/DMA-only.
    acc_ref[...] += jnp.dot(
        x_ref[...], w_ref[...], preferred_element_type=jnp.float32
    )

    @pl.when(k == pl.num_programs(1) - 1)
    def _finalize():
        # Bias added only once, in the finalize branch (not per K step).
        scores_ref[...] = acc_ref[...] + b_ref[...]


def solver_solve(x_nchw, w, b, *, tm_max=256, tk_max=1024):
    """Fused linear-classifier forward (Pallas) + argmax (wrapper).

    x_nchw: [B, C, H, W] float32
    w:      [D, num_classes] float32, D = C*H*W
    b:      [num_classes] float32
    Returns (scores [B, num_classes] f32, predictions [B] int32).
    """
    B = x_nchw.shape[0]
    D = 1
    for s in x_nchw.shape[1:]:
        D *= s
    num_classes = w.shape[1]

    # --- padded / tiled problem sizes -------------------------------------
    n_pad = _round_up(max(num_classes, 128), 128)   # lane-dense class axis
    tm = min(tm_max, _round_up(B, 8))               # batch tile (sublane mult)
    b_pad = _round_up(B, tm)
    tk = min(tk_max, _round_up(D, 128))             # feature (K) tile
    d_pad = _round_up(D, tk)
    grid = (b_pad // tm, d_pad // tk)

    # --- host-side glue: flatten (== torch x.view(B, -1)), pad, cast bf16 --
    x_flat = x_nchw.reshape(B, D).astype(jnp.float32)
    x_p = jnp.pad(x_flat, ((0, b_pad - B), (0, d_pad - D))).astype(jnp.bfloat16)
    w_p = jnp.pad(
        w.astype(jnp.float32), ((0, d_pad - D), (0, n_pad - num_classes))
    ).astype(jnp.bfloat16)
    b_p = jnp.pad(
        b.astype(jnp.float32).reshape(1, num_classes),
        ((0, 0), (0, n_pad - num_classes)),
    )

    scores_pad = pl.pallas_call(
        _solver_fwd_kernel,
        out_shape=jax.ShapeDtypeStruct((b_pad, n_pad), jnp.float32),
        grid_spec=pltpu.PrefetchScalarGridSpec(
            num_scalar_prefetch=0,
            grid=grid,
            in_specs=[
                pl.BlockSpec((tm, tk), lambda i, k: (i, k)),       # x tile
                pl.BlockSpec((tk, n_pad), lambda i, k: (k, 0)),    # W tile
                pl.BlockSpec((1, n_pad), lambda i, k: (0, 0)),     # bias (replicated)
            ],
            out_specs=pl.BlockSpec((tm, n_pad), lambda i, k: (i, 0)),
            scratch_shapes=[pltpu.VMEM((tm, n_pad), jnp.float32)],
        ),
        compiler_params=pltpu.CompilerParams(
            dimension_semantics=("parallel", "arbitrary"),
        ),
    )(x_p, w_p, b_p)

    # Slice padding away; argmax in the wrapper (first index wins ties,
    # matching torch.max(scores, 1)).
    scores = scores_pad[:B, :num_classes]
    preds = jnp.argmax(scores, axis=1).astype(jnp.int32)
    return scores, preds


if __name__ == "__main__":
    # Small shapes consistent with an image-classifier Solver.
    B, C, H, W = 2, 4, 16, 16
    num_classes = 10
    D = C * H * W

    key = jax.random.PRNGKey(0)
    kx, kw, kb = jax.random.split(key, 3)

    x = jax.random.normal(kx, (B, C, H, W), dtype=jnp.float32)
    # Deterministic synthetic parameters (no checkpoint load).
    w = jax.random.normal(kw, (D, num_classes), dtype=jnp.float32) * 0.02
    b = jax.random.normal(kb, (num_classes,), dtype=jnp.float32) * 0.01

    scores, preds = solver_solve(x, w, b)
    jax.block_until_ready((scores, preds))

    # Cross-check against a plain-JAX reference of the same math (inputs
    # rounded to bf16 exactly as the kernel sees them, f32 accumulation).
    x_bf = x.reshape(B, D).astype(jnp.bfloat16).astype(jnp.float32)
    w_bf = w.astype(jnp.bfloat16).astype(jnp.float32)
    ref_scores = x_bf @ w_bf + b
    ref_preds = jnp.argmax(ref_scores, axis=1).astype(jnp.int32)

    assert scores.shape == (B, num_classes)
    assert preds.shape == (B,)
    assert jnp.allclose(scores, ref_scores, atol=1e-3, rtol=1e-3)
    assert jnp.array_equal(preds, ref_preds)

    # TODO(synk): train_a_batch (loss/backward/optimizer step) is training-time
    # logic, not a forward-pass kernel; only forward + solve() are implemented.
    print("KERNEL_OK")
</pallas_src>

<mosaic_0001>
module attributes {stable_mosaic.version = 11 : i64} {
  func.func @_solver_fwd_kernel(%arg0: i32, %arg1: i32, %arg2: memref<8x1024xbf16, #tpu.memory_space<vmem>>, %arg3: memref<1024x128xbf16, #tpu.memory_space<vmem>>, %arg4: memref<1x128xf32, #tpu.memory_space<vmem>>, %arg5: memref<8x128xf32, #tpu.memory_space<vmem>>, %arg6: memref<8x128xf32, #tpu.memory_space<vmem>>) attributes {dimension_semantics = [#tpu.dimension_semantics<parallel>, #tpu.dimension_semantics<arbitrary>], iteration_bounds = array<i64: 1, 1>, scalar_prefetch = 0 : i64, scratch_operands = 1 : i64, tpu.core_type = #tpu.core_type<tc>, window_params = [{transform_indices = @transform_0, window_bounds = array<i64: 8, 1024>}, {transform_indices = @transform_1, window_bounds = array<i64: 1024, 128>}, {pipeline_mode = #tpu.pipeline_mode<synchronous>, transform_indices = @transform_2, window_bounds = array<i64: 1, 128>}, {transform_indices = @transform_3, window_bounds = array<i64: 8, 128>}]} {
    %c0_i32 = arith.constant 0 : i32
    %0 = arith.cmpi eq, %arg1, %c0_i32 : i32
    %1 = arith.extui %0 : i1 to i32
    %c0_i32_0 = arith.constant 0 : i32
    %2 = arith.cmpi ne, %1, %c0_i32_0 : i32
    scf.if %2 {
      %cst_10 = arith.constant 0.000000e+00 : f32
      %12 = vector.broadcast %cst_10 : f32 to vector<8x128xf32>
      %c0_11 = arith.constant 0 : index
      %c0_12 = arith.constant 0 : index
      %13 = vector.load %arg6[%c0_11, %c0_12] : memref<8x128xf32, #tpu.memory_space<vmem>>, vector<8x128xf32>
      tpu.vector_store %arg6[%c0_11, %c0_12], %12 {strides = array<i32>} : memref<8x128xf32, #tpu.memory_space<vmem>>, vector<8x128xf32>,
    } else {
    }
    %c0 = arith.constant 0 : index
    %c0_1 = arith.constant 0 : index
    %3 = vector.load %arg6[%c0, %c0_1] : memref<8x128xf32, #tpu.memory_space<vmem>>, vector<8x128xf32>
    %c0_2 = arith.constant 0 : index
    %c0_3 = arith.constant 0 : index
    %4 = vector.load %arg2[%c0_2, %c0_3] : memref<8x1024xbf16, #tpu.memory_space<vmem>>, vector<8x1024xbf16>
    %c0_4 = arith.constant 0 : index
    %c0_5 = arith.constant 0 : index
    %5 = vector.load %arg3[%c0_4, %c0_5] : memref<1024x128xbf16, #tpu.memory_space<vmem>>, vector<1024x128xbf16>
    %cst = arith.constant dense<0.000000e+00> : vector<8x128xf32>
    %6 = tpu.matmul %4, %5, %cst {dimension_numbers = #tpu.dot_dimension_numbers<[1], [0], [0], [1], [0, 0, 1, 1], [], []>} : vector<8x1024xbf16>, vector<1024x128xbf16>, vector<8x128xf32> -> vector<8x128xf32>
    %7 = arith.addf %3, %6 : vector<8x128xf32>
    %c0_6 = arith.constant 0 : index
    %c0_7 = arith.constant 0 : index
    %8 = vector.load %arg6[%c0_6, %c0_7] : memref<8x128xf32, #tpu.memory_space<vmem>>, vector<8x128xf32>
    tpu.vector_store %arg6[%c0_6, %c0_7], %7 {strides = array<i32>} : memref<8x128xf32, #tpu.memory_space<vmem>>, vector<8x128xf32>,
    %c0_i32_8 = arith.constant 0 : i32
    %9 = arith.cmpi eq, %arg1, %c0_i32_8 : i32
    %10 = arith.extui %9 : i1 to i32
    %c0_i32_9 = arith.constant 0 : i32
    %11 = arith.cmpi ne, %10, %c0_i32_9 : i32
    scf.if %11 {
      %c0_10 = arith.constant 0 : index
      %c0_11 = arith.constant 0 : index
      %12 = vector.load %arg6[%c0_10, %c0_11] : memref<8x128xf32, #tpu.memory_space<vmem>>, vector<8x128xf32>
      %c0_12 = arith.constant 0 : index
      %c0_13 = arith.constant 0 : index
      %13 = vector.load %arg4[%c0_12, %c0_13] : memref<1x128xf32, #tpu.memory_space<vmem>>, vector<1x128xf32>
      %14 = vector.broadcast %13 : vector<1x128xf32> to vector<8x128xf32>
      %15 = arith.addf %12, %14 : vector<8x128xf32>
      %c0_14 = arith.constant 0 : index
      %c0_15 = arith.constant 0 : index
      %16 = vector.load %arg5[%c0_14, %c0_15] : memref<8x128xf32, #tpu.memory_space<vmem>>, vector<8x128xf32>
      tpu.vector_store %arg5[%c0_14, %c0_15], %15 {strides = array<i32>} : memref<8x128xf32, #tpu.memory_space<vmem>>, vector<8x128xf32>,
    } else {
    }
    return
  }
  func.func @transform_0(%arg0: i32, %arg1: i32) -> (i32, i32) {
    %c0_i32 = arith.constant 0 : i32
    return %arg0, %arg1 : i32, i32
  }
  func.func @transform_1(%arg0: i32, %arg1: i32) -> (i32, i32) {
    %c0_i32 = arith.constant 0 : i32
    %c0_i32_0 = arith.constant 0 : i32
    return %arg1, %c0_i32 : i32, i32
  }
  func.func @transform_2(%arg0: i32, %arg1: i32) -> (i32, i32) {
    %c0_i32 = arith.constant 0 : i32
    %c0_i32_0 = arith.constant 0 : i32
    %c0_i32_1 = arith.constant 0 : i32
    return %c0_i32, %c0_i32_0 : i32, i32
  }
  func.func @transform_3(%arg0: i32, %arg1: i32) -> (i32, i32) {
    %c0_i32 = arith.constant 0 : i32
    %c0_i32_0 = arith.constant 0 : i32
    return %arg0, %c0_i32 : i32, i32
  }
}

</mosaic_0001>

<bundles_post_ra>
// kernel: tpu_custom_call.1
= control target key start
LH: loop header
LB: loop body
LE: loop exit
PB: predicated region body
PF: predicated region fallthrough
CT: control target
= control target key end

     0   :  { %8 = vsyncpa [#allocation4], 0  ;;  %s1124_s0 = inlined_call_operand.hbm [shape: bf16[8,1024], index: 0, kind: input, shape index: {}]   ;;  %s1125_s1 = inlined_call_operand.hbm [shape: bf16[1024,128], index: 1, kind: input, shape index: {}]   ;;  %s1126_s2 = inlined_call_operand.vmem [shape: f32[1,128], index: 2, kind: input, shape index: {}]   ;;  %s1127_s3 = inlined_call_operand.hbm [shape: f32[8,128], index: 3, kind: output, shape index: {}]  }
   0x1   :  { %9 = vsyncpa [#allocation7], 0 }
   0x2   :  { %10 = vsyncpa [#allocation5], 0  ;;  %s1087_s12 = smov [#allocation3]   ;;  %s1088_s14 = smov [#allocation6]  }
   0x3   :  { %s17_s13 = sshll.u32 %s1087_s12, 4  ;;  %s26_s15 = sshll.u32 %s1088_s14, 4  ;;  %s18_s13 = int_to_ptr.vmem [resolvable:$true] %s17_s13  ;;  %s27_s15 = int_to_ptr.vmem [resolvable:$true] %s26_s15 }
   0x4   :  { %s1029_s16 = scalar_lea.vmem %s18_s13, 512  ;;  %p1034_p1 = scmp.lt.s32.totalorder %s18_s13, %s18_s13 }
   0x5   :  { %p1030_p0 = scmp.ne.s32.totalorder %s18_s13, %s1029_s16  ;;  %p1035_p2 = scmp.lt.s32.totalorder %s1029_s16, %s1029_s16 }
   0x7   :  { %p1036_p3 = por %p1035_p2, %p1034_p1 }
   0x9   :  { %p1037_p4 = pnand %p1036_p3, %p1030_p0 }
   0xb   :  { %1040 = shalt.err (!%p1037_p4)
}
   0xc   :  { %20 = dma.hbm_to_vmem [thread:$0]  %s1124_s0, 512, %s18_s13, [#allocation4]  }
   0xd   :  { %s1049_s19 = scalar_lea.vmem %s27_s15, 8192  ;;  %p1054_p6 = scmp.lt.s32.totalorder %s27_s15, %s27_s15 }
   0xe   :  { %p1050_p5 = scmp.ne.s32.totalorder %s27_s15, %s1049_s19  ;;  %p1055_p7 = scmp.lt.s32.totalorder %s1049_s19, %s1049_s19 }
  0x10   :  { %p1056_p8 = por %p1055_p7, %p1054_p6 }
  0x12   :  { %p1057_p9 = pnand %p1056_p8, %p1050_p5 }
  0x14   :  { %1060 = shalt.err (!%p1057_p9)
}
  0x15   :  { %s1089_s20 = smov 64   ;;  %s1090_s21 = smov 4  }
  0x16   :  { %32 = dma.hbm_to_vmem [thread:$0]  %s1125_s1, 8192, %s27_s15, [#allocation7], %s1089_s20, %s1089_s20, %s1090_s21  }
  0x17   :  { %1081 = dma.done.wait [#allocation4], 512  }
  0x18   :  { %1082 = vsyncadd [#allocation4], 4294966784 }
  0x19   :  { %1083 = dma.done.wait [#allocation7], 8192  }
  0x1a   :  { %1084 = vsyncadd [#allocation7], 4294959104  ;;  %v949_v0 = vld [vmem:[#allocation6 + $0x78] sm:$0xff]   ;;  %v953_v4 = vld [vmem:[#allocation6 + $0x70] sm:$0xff]   ;;  %s1091_s24 = smov [#allocation8]  }
  0x1b   :  { %v950_v1 = vld [vmem:[#allocation6 + $0xf8] sm:$0xff]   ;;  %856 = vmatprep.subr.bf16.mxu0 %v949_v0  ;;  %v954_v5 = vld [vmem:[#allocation6 + $0xf0] sm:$0xff]   ;;  %v957_v8 = vld [vmem:[#allocation6 + $0x68] sm:$0xff]   ;;  %s773_s25 = sshll.u32 %s1091_s24, 4  ;;  %s774_s25 = int_to_ptr.vmem [resolvable:$true] %s773_s25 }
  0x1c   :  { %v951_v2 = vld [vmem:[#allocation6 + $0x38] sm:$0xff]   ;;  %878 = vmatprep.subr.bf16.mxu1 %v950_v1  ;;  %v955_v6 = vld [vmem:[#allocation6 + $0x30] sm:$0xff]   ;;  %v958_v9 = vld [vmem:[#allocation6 + $0xe8] sm:$0xff]   ;;  %s1061_s26 = scalar_lea.vmem %s774_s25, 128  ;;  %p1066_p11 = scmp.lt.s32.totalorder %s774_s25, %s774_s25 }
  0x1d   :  { %v952_v3 = vld [vmem:[#allocation6 + $0xb8] sm:$0xff]   ;;  %857 = vmatpush3.bf16.msra.mxu0 %v951_v2  ;;  %v956_v7 = vld [vmem:[#allocation6 + $0xb0] sm:$0xff]   ;;  %v959_v10 = vld [vmem:[#allocation6 + $0x28] sm:$0xff]   ;;  %p1062_p10 = scmp.ne.s32.totalorder %s774_s25, %s1061_s26  ;;  %p1067_p12 = scmp.lt.s32.totalorder %s1061_s26, %s1061_s26 }
  0x1e   :  { %879 = vmatpush3.bf16.msra.mxu1 %v952_v3  ;;  %858 = vmatprep.subr.bf16.mxu0 %v953_v4  ;;  %v960_v11 = vld [vmem:[#allocation6 + $0xa8] sm:$0xff]   ;;  %v961_v12 = vld [vmem:[#allocation6 + $0x60] sm:$0xff]   ;;  %v965_v16 = vld [vmem:[#allocation6 + $0x58] sm:$0xff]  }
  0x1f   :  { %880 = vmatprep.subr.bf16.mxu1 %v954_v5  ;;  %v962_v13 = vld [vmem:[#allocation6 + $0xe0] sm:$0xff]   ;;  %v966_v17 = vld [vmem:[#allocation6 + $0xd8] sm:$0xff]   ;;  %v969_v20 = vld [vmem:[#allocation6 + $0x50] sm:$0xff]   ;;  %p1068_p13 = por %p1067_p12, %p1066_p11 }
  0x20   :  { %v963_v14 = vld [vmem:[#allocation6 + $0x20] sm:$0xff]   ;;  %v967_v18 = vld [vmem:[#allocation6 + $0x18] sm:$0xff]   ;;  %v970_v21 = vld [vmem:[#allocation6 + $0xd0] sm:$0xff]  }
  0x21   :  { %859 = vmatpush3.bf16.msra.mxu0 %v955_v6  ;;  %v964_v15 = vld [vmem:[#allocation6 + $0xa0] sm:$0xff]   ;;  %v968_v19 = vld [vmem:[#allocation6 + $0x98] sm:$0xff]   ;;  %v971_v22 = vld [vmem:[#allocation6 + $0x10] sm:$0xff]   ;;  %p1069_p0 = pnand %p1068_p13, %p1062_p10 }
  0x22   :  { %881 = vmatpush3.bf16.msra.mxu1 %v956_v7  ;;  %860 = vmatprep.subr.bf16.mxu0 %v957_v8  ;;  %v972_v23 = vld [vmem:[#allocation6 + $0x90] sm:$0xff]   ;;  %v973_v24 = vld [vmem:[#allocation6 + $0x48] sm:$0xff]   ;;  %v977_v28 = vld [vmem:[#allocation6 + $0x40] sm:$0xff]  }
  0x23   :  { %882 = vmatprep.subr.bf16.mxu1 %v958_v9  ;;  %v974_v25 = vld [vmem:[#allocation6 + $0xc8] sm:$0xff]   ;;  %v978_v29 = vld [vmem:[#allocation6 + $0xc0] sm:$0xff]   ;;  %v985_v38 = vld [vmem:[#allocation6 + $0x178] sm:$0xff]  }
  0x24   :  { %v975_v26 = vld [vmem:[#allocation6 + $0x8] sm:$0xff]   ;;  %v979_v30 = vld [vmem:[#allocation6] sm:$0xff]   ;;  %v986_v39 = vld [vmem:[#allocation6 + $0x1f8] sm:$0xff]  }
  0x25   :  { %861 = vmatpush3.bf16.msra.mxu0 %v959_v10  ;;  %v976_v27 = vld [vmem:[#allocation6 + $0x88] sm:$0xff]   ;;  %v980_v31 = vld [vmem:[#allocation6 + $0x80] sm:$0xff]   ;;  %v987_v40 = vld [vmem:[#allocation6 + $0x138] sm:$0xff]  }
  0x26   :  { %883 = vmatpush3.bf16.msra.mxu1 %v960_v11  ;;  %862 = vmatprep.subr.bf16.mxu0 %v961_v12  ;;  %v48_v32 = vld [vmem:[#allocation3] sm:$0xff]  ;;  %v49_v33 = vld [vmem:[#allocation3 + $0x8] sm:$0xff]  ;;  %v988_v41 = vld [vmem:[#allocation6 + $0x1b8] sm:$0xff]  }
  0x27   :  { %884 = vmatprep.subr.bf16.mxu1 %v962_v13  ;;  %v783_v34 = vcombine.low %v48_v32, %v48_v32  ;;  %v784_v35 = vcombine.high %v48_v32, %v48_v32  ;;  %v785_v36 = vcombine.low %v49_v33, %v49_v33  ;;  %v786_v37 = vcombine.high %v49_v33, %v49_v33  ;;  %v989_v42 = vld [vmem:[#allocation6 + $0x170] sm:$0xff]   ;;  %v993_v46 = vld [vmem:[#allocation6 + $0x168] sm:$0xff]   ;;  %v997_v50 = vld [vmem:[#allocation6 + $0x160] sm:$0xff]  }
  0x28   :  { %v990_v43 = vld [vmem:[#allocation6 + $0x1f0] sm:$0xff]   ;;  %v994_v47 = vld [vmem:[#allocation6 + $0x1e8] sm:$0xff]   ;;  %v998_v51 = vld [vmem:[#allocation6 + $0x1e0] sm:$0xff]  }
  0x29   :  { %863 = vmatpush3.bf16.msra.mxu0 %v963_v14  ;;  %624 = vmatprep.mubr.bf16.mxu0 %v784_v35  ;;  %v991_v44 = vld [vmem:[#allocation6 + $0x130] sm:$0xff]   ;;  %v995_v48 = vld [vmem:[#allocation6 + $0x128] sm:$0xff]   ;;  %v999_v52 = vld [vmem:[#allocation6 + $0x120] sm:$0xff]  }
  0x2a   :  { %885 = vmatpush3.bf16.msra.mxu1 %v964_v15  ;;  %864 = vmatprep.subr.bf16.mxu0 %v965_v16  ;;  %v992_v45 = vld [vmem:[#allocation6 + $0x1b0] sm:$0xff]   ;;  %v996_v49 = vld [vmem:[#allocation6 + $0x1a8] sm:$0xff]   ;;  %v1000_v53 = vld [vmem:[#allocation6 + $0x1a0] sm:$0xff]  }
  0x2b   :  { %886 = vmatprep.subr.bf16.mxu1 %v966_v17  ;;  %664 = vmatprep.mubr.bf16.mxu1 %v786_v37  ;;  %v1001_v54 = vld [vmem:[#allocation6 + $0x158] sm:$0xff]   ;;  %v1005_v58 = vld [vmem:[#allocation6 + $0x150] sm:$0xff]   ;;  %v1009_v62 = vld [vmem:[#allocation6 + $0x148] sm:$0xff]  }
  0x2c   :  { %v1002_v55 = vld [vmem:[#allocation6 + $0x1d8] sm:$0xff]   ;;  %v1006_v59 = vld [vmem:[#allocation6 + $0x1d0] sm:$0xff]   ;;  %v1010_v63 = vld [vmem:[#allocation6 + $0x1c8] sm:$0xff]  }
  0x2d   :  { %865 = vmatpush3.bf16.msra.mxu0 %v967_v18  ;;  %v1003_v56 = vld [vmem:[#allocation6 + $0x118] sm:$0xff]   ;;  %v1007_v60 = vld [vmem:[#allocation6 + $0x110] sm:$0xff]   ;;  %v1011_v0 = vld [vmem:[#allocation6 + $0x108] sm:$0xff]  }
  0x2e   :  { %887 = vmatpush3.bf16.msra.mxu1 %v968_v19  ;;  %866 = vmatprep.subr.bf16.mxu0 %v969_v20  ;;  %v1004_v57 = vld [vmem:[#allocation6 + $0x198] sm:$0xff]   ;;  %v1008_v61 = vld [vmem:[#allocation6 + $0x190] sm:$0xff]   ;;  %v1012_v1 = vld [vmem:[#allocation6 + $0x188] sm:$0xff]  }
  0x2f   :  { %888 = vmatprep.subr.bf16.mxu1 %v970_v21  ;;  %v1013_v2 = vld [vmem:[#allocation6 + $0x140] sm:$0xff]   ;;  %v50_v6 = vld [vmem:[#allocation3 + $0x10] sm:$0xff]  ;;  %v51_v9 = vld [vmem:[#allocation3 + $0x18] sm:$0xff] }
  0x30   :  { %v1014_v3 = vld [vmem:[#allocation6 + $0x1c0] sm:$0xff]   ;;  %v787_v7 = vcombine.low %v50_v6, %v50_v6  ;;  %v788_v8 = vcombine.high %v50_v6, %v50_v6  ;;  %v789_v10 = vcombine.low %v51_v9, %v51_v9  ;;  %v790_v11 = vcombine.high %v51_v9, %v51_v9 }
  0x31   :  { %867 = vmatpush3.bf16.msra.mxu0 %v971_v22  ;;  %v1015_v4 = vld [vmem:[#allocation6 + $0x100] sm:$0xff]  }
  0x32   :  { %889 = vmatpush3.bf16.msra.mxu1 %v972_v23  ;;  %868 = vmatprep.subr.bf16.mxu0 %v973_v24  ;;  %v1016_v5 = vld [vmem:[#allocation6 + $0x180] sm:$0xff]  }
  0x33   :  { %890 = vmatprep.subr.bf16.mxu1 %v974_v25 }
  0x35   :  { %869 = vmatpush3.bf16.msra.mxu0 %v975_v26 }
  0x36   :  { %891 = vmatpush3.bf16.msra.mxu1 %v976_v27  ;;  %870 = vmatprep.subr.bf16.mxu0 %v977_v28 }
  0x37   :  { %892 = vmatprep.subr.bf16.mxu1 %v978_v29 }
  0x39   :  { %871 = vmatpush3.bf16.msra.mxu0 %v979_v30 }
  0x3a   :  { %893 = vmatpush3.bf16.msra.mxu1 %v980_v31  ;;  %900 = vmatprep.subr.bf16.mxu0 %v985_v38 }
  0x3b   :  { %922 = vmatprep.subr.bf16.mxu1 %v986_v39 }
  0x3c   :  { %625 = vmatmul.mubr.bf16.vlgmr.msra.gmra.mxu0 %v783_v34  ;;  %v855_v34 = vld [vmem:[%s1126_s2] ss:$0 sm:$0xff] }
  0x3d   :  { %665 = vmatmul.mubr.bf16.vlgmr.msra.gmra.mxu1 %v785_v36  ;;  %901 = vmatpush3.bf16.msra.mxu0 %v987_v40 }
  0x3e   :  { %923 = vmatpush3.bf16.msra.mxu1 %v988_v41  ;;  %902 = vmatprep.subr.bf16.mxu0 %v989_v42 }
  0x3f   :  { %924 = vmatprep.subr.bf16.mxu1 %v990_v43  ;;  %704 = vmatprep.mubr.bf16.mxu0 %v788_v8 }
  0x40   :  { %744 = vmatprep.mubr.bf16.mxu1 %v790_v11 }
  0x41   :  { %903 = vmatpush3.bf16.msra.mxu0 %v991_v44 }
  0x42   :  { %925 = vmatpush3.bf16.msra.mxu1 %v992_v45  ;;  %904 = vmatprep.subr.bf16.mxu0 %v993_v46 }
  0x43   :  { %926 = vmatprep.subr.bf16.mxu1 %v994_v47 }
  0x45   :  { %905 = vmatpush3.bf16.msra.mxu0 %v995_v48 }
  0x46   :  { %927 = vmatpush3.bf16.msra.mxu1 %v996_v49  ;;  %906 = vmatprep.subr.bf16.mxu0 %v997_v50 }
  0x47   :  { %928 = vmatprep.subr.bf16.mxu1 %v998_v51 }
  0x49   :  { %907 = vmatpush3.bf16.msra.mxu0 %v999_v52 }
  0x4a   :  { %929 = vmatpush3.bf16.msra.mxu1 %v1000_v53  ;;  %908 = vmatprep.subr.bf16.mxu0 %v1001_v54 }
  0x4b   :  { %930 = vmatprep.subr.bf16.mxu1 %v1002_v55 }
  0x4d   :  { %909 = vmatpush3.bf16.msra.mxu0 %v1003_v56 }
  0x4e   :  { %931 = vmatpush3.bf16.msra.mxu1 %v1004_v57  ;;  %910 = vmatprep.subr.bf16.mxu0 %v1005_v58 }
  0x4f   :  { %932 = vmatprep.subr.bf16.mxu1 %v1006_v59 }
  0x51   :  { %911 = vmatpush3.bf16.msra.mxu0 %v1007_v60 }
  0x52   :  { %933 = vmatpush3.bf16.msra.mxu1 %v1008_v61  ;;  %912 = vmatprep.subr.bf16.mxu0 %v1009_v62 }
  0x53   :  { %934 = vmatprep.subr.bf16.mxu1 %v1010_v63 }
  0x55   :  { %913 = vmatpush3.bf16.msra.mxu0 %v1011_v0 }
  0x56   :  { %935 = vmatpush3.bf16.msra.mxu1 %v1012_v1  ;;  %914 = vmatprep.subr.bf16.mxu0 %v1013_v2 }
  0x57   :  { %936 = vmatprep.subr.bf16.mxu1 %v1014_v3 }
  0x59   :  { %915 = vmatpush3.bf16.msra.mxu0 %v1015_v4 }
  0x5a   :  { %937 = vmatpush3.bf16.msra.mxu1 %v1016_v5 }
  0x5c   :  { %705 = vmatmul.mubr.bf16.vlgmr.msra.gmra.mxu0 %v787_v7 }
  0x5d   :  { %745 = vmatmul.mubr.bf16.vlgmr.msra.gmra.mxu1 %v789_v10 }
  0xfc   :  { %v872_v12 = vpop.f32.mrf.mxu0 }
  0xfd   :  { %v894_v13 = vpop.f32.mrf.mxu1 }
  0xfe   :  { %v873_v14 = vpop.f32.mrf.mxu0 }
  0xff   :  { %v895_v15 = vpop.f32.mrf.mxu1  ;;  %v874_v20 = vadd.f32 %v873_v14, %v872_v12 }
 0x100   :  { %v875_v16 = vpop.f32.mrf.mxu0  ;;  %v896_v21 = vadd.f32 %v895_v15, %v894_v13 }
 0x101   :  { %v897_v17 = vpop.f32.mrf.mxu1 }
 0x102   :  { %v876_v18 = vpop.f32.mrf.mxu0  ;;  %v667_v26 = vadd.f32 %v896_v21, %v874_v20 }
 0x103   :  { %v898_v19 = vpop.f32.mrf.mxu1 }
 0x11c   :  { %v916_v22 = vpop.f32.mrf.mxu0 }
 0x11d   :  { %v938_v23 = vpop.f32.mrf.mxu1 }
 0x11e   :  { %v917_v24 = vpop.f32.mrf.mxu0 }
 0x11f   :  { %v939_v25 = vpop.f32.mrf.mxu1  ;;  %v918_v27 = vadd.f32 %v917_v24, %v916_v22 }
 0x120   :  { %v919_v28 = vpop.f32.mrf.mxu0  ;;  %v940_v31 = vadd.f32 %v939_v25, %v938_v23 }
 0x121   :  { %v941_v29 = vpop.f32.mrf.mxu1  ;;  %v707_v30 = vadd.f32 %v918_v27, %v667_v26 }
 0x122   :  { %v920_v32 = vpop.f32.mrf.mxu0 }
 0x123   :  { %v942_v33 = vpop.f32.mrf.mxu1  ;;  %v747_v35 = vadd.f32 %v940_v31, %v707_v30 }
 0x125   :  { %v765_v36 = vadd.f32 %v855_v34, %v747_v35 }
 0x127   :  { %766 = vst [vmem:[#allocation8] sm:$0xff] %v765_v36 }
 0x128   :  { %1072 = shalt.err (!%p1069_p0)
}
 0x129   :  { %776 = dma.vmem_to_hbm [thread:$0]  %s774_s25, 128, %s1127_s3, [#allocation5]  }
 0x12a   :  { %1085 = dma.done.wait [#allocation5], 128  }
 0x12b   :  { %1086 = vsyncadd [#allocation5], 4294967168 }
 0x12c   :  { %780 = vsyncpa [#allocation4], 1 }
 0x12d   :  { %781 = vsyncpa [#allocation7], 1 }
 0x12e   :  { %782 = vsyncpa [#allocation5], 1 }

</bundles_post_ra>
